<compile_context>
chip_gen: v6e
topology: v6e:2x2x1
jax: 0.10.0
libtpu: 0.0.40
codegen_flags: <defaults>
</compile_context>

<pallas_src>
import jax
import jax.numpy as jnp
from jax.experimental import pallas as pl
from jax.experimental.pallas import tpu as pltpu


# ----------------------------------------------------------------------------
# Kernel
# ----------------------------------------------------------------------------
def encodeur_kernel(x_ref, w1_ref, b1_ref, wh_ref, bh_ref, out_ref):
    # Cast x to the matmul dtype *inside* the kernel (VPU) -- x stays f32 in HBM,
    # so there is no extra wrapper-side HBM pass over the batch.
    x = x_ref[...].astype(w1_ref.dtype)

    # First linear + ReLU: MXU matmul with f32 accumulation, bias/ReLU in f32.
    h = jnp.dot(x, w1_ref[...], preferred_element_type=jnp.float32)
    h = jnp.maximum(h + b1_ref[...], 0.0)

    # Fused heads: one lane-dense (TILE_B, 2*dimReduit) matmul; columns are
    # [ecart | moyenne]. h is cast down only at the MXU input.
    out = jnp.dot(h.astype(wh_ref.dtype), wh_ref[...],
                  preferred_element_type=jnp.float32) + bh_ref[...]
    out_ref[...] = out.astype(out_ref.dtype)


# ----------------------------------------------------------------------------
# One-time parameter preparation (PyTorch (out,in) -> (in,out), head fusion)
# ----------------------------------------------------------------------------
def prepare_params(params, compute_dtype=jnp.bfloat16):
    """Transpose PyTorch nn.Linear weights to (in, out), fuse the two heads into a
    single (dimInter, 2*dimReduit) weight, keep biases as 2-D f32 rows.
    Default compute dtype is bf16 (native MXU rate on v5e/v6e/v7x, half the HBM
    bytes for resident weights); pass jnp.float32 for an exact reference path."""
    w1 = params["inter_w"].T.astype(compute_dtype)                  # (E, I)
    b1 = params["inter_b"][None, :].astype(jnp.float32)             # (1, I)
    wh = jnp.concatenate([params["ect_w"].T, params["moy_w"].T],
                         axis=1).astype(compute_dtype)               # (I, 2R) = [ect | moy]
    bh = jnp.concatenate([params["ect_b"], params["moy_b"]],
                         axis=0)[None, :].astype(jnp.float32)        # (1, 2R)
    return {"w1": w1, "b1": b1, "wh": wh, "bh": bh}


# ----------------------------------------------------------------------------
# Sizing helpers
# ----------------------------------------------------------------------------
def _vmem_cap_bytes():
    """~75% of this chip's per-core VMEM (~48 MiB on v7x, ~96 MiB on v5e/v6e)."""
    try:
        cap = pltpu.get_tpu_info().vmem_capacity_bytes
    except Exception:
        cap = 64 << 20  # conservative fallback: assume v7x's 64 MiB / TensorCore
    return int(cap * 3 // 4)


def _vmem_limit_bytes(tb, dim_e, dim_i, two_r, w_bytes):
    total = (2 * tb * dim_e * 4            # double-buffered f32 x tiles
             + 2 * tb * two_r * 4          # double-buffered f32 out tiles
             + 2 * dim_e * dim_i * w_bytes # w1 (counted x2 even if single-buffered)
             + 2 * dim_i * two_r * w_bytes # fused head weight
             + 2 * (dim_i + two_r) * 4)    # biases
    total += 4 << 20                       # headroom for compiler scratch
    return int(min(max(total, 8 << 20), _vmem_cap_bytes()))


def _choose_tb(B, tile_b, align):
    """Pick a batch tile: as large as possible (up to tile_b), aligned, preferring
    a divisor of B (no padding pass over x), and giving >= 2 grid steps when the
    batch is big enough (so v7x's two TensorCores both get work)."""
    if B <= align:
        return B                                  # single block = full batch dim
    cap = min(tile_b, B)
    if B >= 2 * align:
        cap = min(cap, -(-B // 2))                # ensure at least 2 grid steps
    tb = max(align, (cap // align) * align)
    t = tb
    for _ in range(64):                           # bounded search for a divisor
        if t < align:
            break
        if B % t == 0:
            return t
        t -= align
    return tb                                     # no aligned divisor: caller pads


# ----------------------------------------------------------------------------
# pallas_call builder + forward wrappers
# ----------------------------------------------------------------------------
def _build_call(tb, b_pad, dim_e, dim_i, two_r, out_dtype, vmem_bytes, use_buffered):
    def resident(shape):
        kwargs = {"pipeline_mode": pl.Buffered(1)} if use_buffered else {}
        return pl.BlockSpec(shape, lambda i: (0,) * len(shape), **kwargs)

    return pl.pallas_call(
        encodeur_kernel,
        out_shape=jax.ShapeDtypeStruct((b_pad, two_r), out_dtype),
        grid=(b_pad // tb,),
        in_specs=[
            pl.BlockSpec((tb, dim_e), lambda i: (i, 0)),   # x: pipelined over batch
            resident((dim_e, dim_i)),                      # w1: resident in VMEM
            resident((1, dim_i)),                          # b1
            resident((dim_i, two_r)),                      # fused head weight
            resident((1, two_r)),                          # fused head bias
        ],
        out_specs=pl.BlockSpec((tb, two_r), lambda i: (i, 0)),
        compiler_params=pltpu.CompilerParams(
            dimension_semantics=("parallel",),
            vmem_limit_bytes=vmem_bytes,
        ),
    )


def encodeur_forward_fused(x, prepared, *, tile_b=1024):
    """x: [B, dimEntree] float32. Returns the fused (B, 2*dimReduit) output whose
    columns are [ecart | moyenne]. Use this entry point to avoid epilogue split
    copies when the consumer can slice lazily / fuse the split itself."""
    B, dim_e = x.shape
    dim_i = prepared["w1"].shape[1]
    two_r = prepared["wh"].shape[1]
    w_bytes = jnp.dtype(prepared["w1"].dtype).itemsize

    # bf16 packs 2 rows per sublane -> prefer 16-aligned batch tiles in that case.
    align = 16 if prepared["w1"].dtype == jnp.bfloat16 else 8
    tb = _choose_tb(B, tile_b, align)
    b_pad = pl.cdiv(B, tb) * tb

    x_in = x
    if b_pad != B:
        # Only hit when no aligned tile divides B (rare); otherwise x is untouched.
        x_in = jnp.pad(x, ((0, b_pad - B), (0, 0)))

    vmem_bytes = _vmem_limit_bytes(tb, dim_e, dim_i, two_r, w_bytes)
    args = (x_in, prepared["w1"], prepared["b1"], prepared["wh"], prepared["bh"])

    def run(use_buffered):
        return _build_call(tb, b_pad, dim_e, dim_i, two_r, x.dtype,
                           vmem_bytes, use_buffered)(*args)

    if hasattr(pl, "Buffered"):
        try:
            fused = run(True)
        except Exception:
            # Fallback if this JAX build rejects pipeline_mode on pallas_call specs.
            fused = run(False)
    else:
        fused = run(False)

    if b_pad != B:
        fused = fused[:B]
    return fused


def encodeur_forward(x, prepared, *, tile_b=1024):
    """Matches the PyTorch module's return: (ecart, moyenne)."""
    fused = encodeur_forward_fused(x, prepared, tile_b=tile_b)
    dim_r = fused.shape[1] // 2
    # Under jit these slices fuse with the consumer; use encodeur_forward_fused
    # directly if you need to avoid the eager split copies.
    return fused[:, :dim_r], fused[:, dim_r:]


# ----------------------------------------------------------------------------
# Reference + test harness
# ----------------------------------------------------------------------------
def init_params(key, dimEntree, dimInter, dimReduit):
    """Deterministic synthetic parameters in PyTorch nn.Linear convention (out, in)."""
    ks = jax.random.split(key, 6)
    s1 = 1.0 / jnp.sqrt(dimEntree)
    s2 = 1.0 / jnp.sqrt(dimInter)
    return {
        "inter_w": jax.random.uniform(ks[0], (dimInter, dimEntree), jnp.float32, -s1, s1),
        "inter_b": jax.random.uniform(ks[1], (dimInter,), jnp.float32, -s1, s1),
        "moy_w":   jax.random.uniform(ks[2], (dimReduit, dimInter), jnp.float32, -s2, s2),
        "moy_b":   jax.random.uniform(ks[3], (dimReduit,), jnp.float32, -s2, s2),
        "ect_w":   jax.random.uniform(ks[4], (dimReduit, dimInter), jnp.float32, -s2, s2),
        "ect_b":   jax.random.uniform(ks[5], (dimReduit,), jnp.float32, -s2, s2),
    }


def encodeur_ref(x, params):
    """Pure-JAX reference matching the PyTorch module exactly."""
    h = jnp.maximum(x @ params["inter_w"].T + params["inter_b"], 0.0)
    moyenne = h @ params["moy_w"].T + params["moy_b"]
    ecart = h @ params["ect_w"].T + params["ect_b"]
    return ecart, moyenne


if __name__ == "__main__":
    B, dimEntree, dimInter, dimReduit = 8, 256, 128, 64

    key = jax.random.PRNGKey(0)
    kx, kp = jax.random.split(key)
    x = jax.random.normal(kx, (B, dimEntree), jnp.float32)
    params = init_params(kp, dimEntree, dimInter, dimReduit)
    ecart_ref, moyenne_ref = encodeur_ref(x, params)

    # f32-weight path (exact-ish vs the PyTorch/f32 reference)
    prepared_f32 = prepare_params(params, compute_dtype=jnp.float32)
    ecart, moyenne = encodeur_forward(x, prepared_f32)
    jax.block_until_ready((ecart, moyenne))
    assert ecart.shape == (B, dimReduit) and moyenne.shape == (B, dimReduit)
    assert jnp.allclose(ecart, ecart_ref, atol=1e-5, rtol=1e-5)
    assert jnp.allclose(moyenne, moyenne_ref, atol=1e-5, rtol=1e-5)

    # Default bf16 matmul-input path (f32 accumulation / bias / ReLU) -- looser tol.
    prepared_bf16 = prepare_params(params)
    ecart_b, moyenne_b = encodeur_forward(x, prepared_bf16)
    jax.block_until_ready((ecart_b, moyenne_b))
    assert jnp.allclose(ecart_b, ecart_ref, atol=1e-1, rtol=1e-1)
    assert jnp.allclose(moyenne_b, moyenne_ref, atol=1e-1, rtol=1e-1)

    print("KERNEL_OK")
</pallas_src>

<mosaic_0001>
module attributes {stable_mosaic.version = 11 : i64} {
  func.func @encodeur_kernel(%arg0: i32, %arg1: memref<8x256xf32, #tpu.memory_space<vmem>>, %arg2: memref<256x128xf32, #tpu.memory_space<vmem>>, %arg3: memref<1x128xf32, #tpu.memory_space<vmem>>, %arg4: memref<128x128xf32, #tpu.memory_space<vmem>>, %arg5: memref<1x128xf32, #tpu.memory_space<vmem>>, %arg6: memref<8x128xf32, #tpu.memory_space<vmem>>) attributes {dimension_semantics = [#tpu.dimension_semantics<parallel>], iteration_bounds = array<i64: 1>, scalar_prefetch = 0 : i64, scratch_operands = 0 : i64, tpu.core_type = #tpu.core_type<tc>, window_params = [{transform_indices = @transform_0, window_bounds = array<i64: 8, 256>}, {pipeline_mode = #tpu.pipeline_mode<synchronous>, transform_indices = @transform_1, window_bounds = array<i64: 256, 128>}, {pipeline_mode = #tpu.pipeline_mode<synchronous>, transform_indices = @transform_2, window_bounds = array<i64: 1, 128>}, {pipeline_mode = #tpu.pipeline_mode<synchronous>, transform_indices = @transform_3, window_bounds = array<i64: 128, 128>}, {pipeline_mode = #tpu.pipeline_mode<synchronous>, transform_indices = @transform_4, window_bounds = array<i64: 1, 128>}, {transform_indices = @transform_5, window_bounds = array<i64: 8, 128>}]} {
    %c0 = arith.constant 0 : index
    %c0_0 = arith.constant 0 : index
    %0 = vector.load %arg1[%c0, %c0_0] : memref<8x256xf32, #tpu.memory_space<vmem>>, vector<8x256xf32>
    %c0_1 = arith.constant 0 : index
    %c0_2 = arith.constant 0 : index
    %1 = vector.load %arg2[%c0_1, %c0_2] : memref<256x128xf32, #tpu.memory_space<vmem>>, vector<256x128xf32>
    %cst = arith.constant dense<0.000000e+00> : vector<8x128xf32>
    %2 = tpu.matmul %0, %1, %cst {dimension_numbers = #tpu.dot_dimension_numbers<[1], [0], [0], [1], [0, 0, 1, 1], [], []>} : vector<8x256xf32>, vector<256x128xf32>, vector<8x128xf32> -> vector<8x128xf32>
    %c0_3 = arith.constant 0 : index
    %c0_4 = arith.constant 0 : index
    %3 = vector.load %arg3[%c0_3, %c0_4] : memref<1x128xf32, #tpu.memory_space<vmem>>, vector<1x128xf32>
    %4 = vector.broadcast %3 : vector<1x128xf32> to vector<8x128xf32>
    %5 = arith.addf %2, %4 : vector<8x128xf32>
    %cst_5 = arith.constant 0.000000e+00 : f32
    %6 = vector.broadcast %cst_5 : f32 to vector<8x128xf32>
    %7 = arith.maximumf %5, %6 : vector<8x128xf32>
    %c0_6 = arith.constant 0 : index
    %c0_7 = arith.constant 0 : index
    %8 = vector.load %arg4[%c0_6, %c0_7] : memref<128x128xf32, #tpu.memory_space<vmem>>, vector<128x128xf32>
    %cst_8 = arith.constant dense<0.000000e+00> : vector<8x128xf32>
    %9 = tpu.matmul %7, %8, %cst_8 {dimension_numbers = #tpu.dot_dimension_numbers<[1], [0], [0], [1], [0, 0, 1, 1], [], []>} : vector<8x128xf32>, vector<128x128xf32>, vector<8x128xf32> -> vector<8x128xf32>
    %c0_9 = arith.constant 0 : index
    %c0_10 = arith.constant 0 : index
    %10 = vector.load %arg5[%c0_9, %c0_10] : memref<1x128xf32, #tpu.memory_space<vmem>>, vector<1x128xf32>
    %11 = vector.broadcast %10 : vector<1x128xf32> to vector<8x128xf32>
    %12 = arith.addf %9, %11 : vector<8x128xf32>
    %c0_11 = arith.constant 0 : index
    %c0_12 = arith.constant 0 : index
    %13 = vector.load %arg6[%c0_11, %c0_12] : memref<8x128xf32, #tpu.memory_space<vmem>>, vector<8x128xf32>
    tpu.vector_store %arg6[%c0_11, %c0_12], %12 {strides = array<i32>} : memref<8x128xf32, #tpu.memory_space<vmem>>, vector<8x128xf32>,
    return
  }
  func.func @transform_0(%arg0: i32) -> (i32, i32) {
    %c0_i32 = arith.constant 0 : i32
    %c0_i32_0 = arith.constant 0 : i32
    return %arg0, %c0_i32 : i32, i32
  }
  func.func @transform_1(%arg0: i32) -> (i32, i32) {
    %c0_i32 = arith.constant 0 : i32
    %c0_i32_0 = arith.constant 0 : i32
    %c0_i32_1 = arith.constant 0 : i32
    return %c0_i32, %c0_i32_0 : i32, i32
  }
  func.func @transform_2(%arg0: i32) -> (i32, i32) {
    %c0_i32 = arith.constant 0 : i32
    %c0_i32_0 = arith.constant 0 : i32
    %c0_i32_1 = arith.constant 0 : i32
    return %c0_i32, %c0_i32_0 : i32, i32
  }
  func.func @transform_3(%arg0: i32) -> (i32, i32) {
    %c0_i32 = arith.constant 0 : i32
    %c0_i32_0 = arith.constant 0 : i32
    %c0_i32_1 = arith.constant 0 : i32
    return %c0_i32, %c0_i32_0 : i32, i32
  }
  func.func @transform_4(%arg0: i32) -> (i32, i32) {
    %c0_i32 = arith.constant 0 : i32
    %c0_i32_0 = arith.constant 0 : i32
    %c0_i32_1 = arith.constant 0 : i32
    return %c0_i32, %c0_i32_0 : i32, i32
  }
  func.func @transform_5(%arg0: i32) -> (i32, i32) {
    %c0_i32 = arith.constant 0 : i32
    %c0_i32_0 = arith.constant 0 : i32
    return %arg0, %c0_i32 : i32, i32
  }
}

module attributes {stable_mosaic.version = 11 : i64} {
  func.func @encodeur_kernel(%arg0: i32, %arg1: memref<8x256xf32, #tpu.memory_space<vmem>>, %arg2: memref<256x128xf32, #tpu.memory_space<vmem>>, %arg3: memref<1x128xf32, #tpu.memory_space<vmem>>, %arg4: memref<128x128xf32, #tpu.memory_space<vmem>>, %arg5: memref<1x128xf32, #tpu.memory_space<vmem>>, %arg6: memref<8x128xf32, #tpu.memory_space<vmem>>) attributes {dimension_semantics = [#tpu.dimension_semantics<parallel>], iteration_bounds = array<i64: 1>, scalar_prefetch = 0 : i64, scratch_operands = 0 : i64, tpu.core_type = #tpu.core_type<tc>, window_params = [{transform_indices = @transform_0, window_bounds = array<i64: 8, 256>}, {pipeline_mode = #tpu.pipeline_mode<synchronous>, transform_indices = @transform_1, window_bounds = array<i64: 256, 128>}, {pipeline_mode = #tpu.pipeline_mode<synchronous>, transform_indices = @transform_2, window_bounds = array<i64: 1, 128>}, {pipeline_mode = #tpu.pipeline_mode<synchronous>, transform_indices = @transform_3, window_bounds = array<i64: 128, 128>}, {pipeline_mode = #tpu.pipeline_mode<synchronous>, transform_indices = @transform_4, window_bounds = array<i64: 1, 128>}, {transform_indices = @transform_5, window_bounds = array<i64: 8, 128>}]} {
    %c0 = arith.constant 0 : index
    %c0_0 = arith.constant 0 : index
    %0 = vector.load %arg1[%c0, %c0_0] : memref<8x256xf32, #tpu.memory_space<vmem>>, vector<8x256xf32>
    %c0_1 = arith.constant 0 : index
    %c0_2 = arith.constant 0 : index
    %1 = vector.load %arg2[%c0_1, %c0_2] : memref<256x128xf32, #tpu.memory_space<vmem>>, vector<256x128xf32>
    %cst = arith.constant dense<0.000000e+00> : vector<8x128xf32>
    %2 = tpu.matmul %0, %1, %cst {dimension_numbers = #tpu.dot_dimension_numbers<[1], [0], [0], [1], [0, 0, 1, 1], [], []>} : vector<8x256xf32>, vector<256x128xf32>, vector<8x128xf32> -> vector<8x128xf32>
    %c0_3 = arith.constant 0 : index
    %c0_4 = arith.constant 0 : index
    %3 = vector.load %arg3[%c0_3, %c0_4] : memref<1x128xf32, #tpu.memory_space<vmem>>, vector<1x128xf32>
    %4 = vector.broadcast %3 : vector<1x128xf32> to vector<8x128xf32>
    %5 = arith.addf %2, %4 : vector<8x128xf32>
    %cst_5 = arith.constant 0.000000e+00 : f32
    %6 = vector.broadcast %cst_5 : f32 to vector<8x128xf32>
    %7 = arith.maximumf %5, %6 : vector<8x128xf32>
    %c0_6 = arith.constant 0 : index
    %c0_7 = arith.constant 0 : index
    %8 = vector.load %arg4[%c0_6, %c0_7] : memref<128x128xf32, #tpu.memory_space<vmem>>, vector<128x128xf32>
    %cst_8 = arith.constant dense<0.000000e+00> : vector<8x128xf32>
    %9 = tpu.matmul %7, %8, %cst_8 {dimension_numbers = #tpu.dot_dimension_numbers<[1], [0], [0], [1], [0, 0, 1, 1], [], []>} : vector<8x128xf32>, vector<128x128xf32>, vector<8x128xf32> -> vector<8x128xf32>
    %c0_9 = arith.constant 0 : index
    %c0_10 = arith.constant 0 : index
    %10 = vector.load %arg5[%c0_9, %c0_10] : memref<1x128xf32, #tpu.memory_space<vmem>>, vector<1x128xf32>
    %11 = vector.broadcast %10 : vector<1x128xf32> to vector<8x128xf32>
    %12 = arith.addf %9, %11 : vector<8x128xf32>
    %c0_11 = arith.constant 0 : index
    %c0_12 = arith.constant 0 : index
    %13 = vector.load %arg6[%c0_11, %c0_12] : memref<8x128xf32, #tpu.memory_space<vmem>>, vector<8x128xf32>
    tpu.vector_store %arg6[%c0_11, %c0_12], %12 {strides = array<i32>} : memref<8x128xf32, #tpu.memory_space<vmem>>, vector<8x128xf32>,
    return
  }
  func.func @transform_0(%arg0: i32) -> (i32, i32) {
    %c0_i32 = arith.constant 0 : i32
    %c0_i32_0 = arith.constant 0 : i32
    return %arg0, %c0_i32 : i32, i32
  }
  func.func @transform_1(%arg0: i32) -> (i32, i32) {
    %c0_i32 = arith.constant 0 : i32
    %c0_i32_0 = arith.constant 0 : i32
    %c0_i32_1 = arith.constant 0 : i32
    return %c0_i32, %c0_i32_0 : i32, i32
  }
  func.func @transform_2(%arg0: i32) -> (i32, i32) {
    %c0_i32 = arith.constant 0 : i32
    %c0_i32_0 = arith.constant 0 : i32
    %c0_i32_1 = arith.constant 0 : i32
    return %c0_i32, %c0_i32_0 : i32, i32
  }
  func.func @transform_3(%arg0: i32) -> (i32, i32) {
    %c0_i32 = arith.constant 0 : i32
    %c0_i32_0 = arith.constant 0 : i32
    %c0_i32_1 = arith.constant 0 : i32
    return %c0_i32, %c0_i32_0 : i32, i32
  }
  func.func @transform_4(%arg0: i32) -> (i32, i32) {
    %c0_i32 = arith.constant 0 : i32
    %c0_i32_0 = arith.constant 0 : i32
    %c0_i32_1 = arith.constant 0 : i32
    return %c0_i32, %c0_i32_0 : i32, i32
  }
  func.func @transform_5(%arg0: i32) -> (i32, i32) {
    %c0_i32 = arith.constant 0 : i32
    %c0_i32_0 = arith.constant 0 : i32
    return %arg0, %c0_i32 : i32, i32
  }
}

</mosaic_0001>

<bundles_post_ra>
// kernel: tpu_custom_call.1
= control target key start
LH: loop header
LB: loop body
LE: loop exit
PB: predicated region body
PF: predicated region fallthrough
CT: control target
= control target key end

     0   :  { %10 = vsyncpa [#allocation3], 0  ;;  %s538_s0 = inlined_call_operand.hbm [shape: f32[8,256], index: 0, kind: input, shape index: {}]   ;;  %s539_s1 = inlined_call_operand.hbm [shape: f32[256,128], index: 1, kind: input, shape index: {}]   ;;  %s540_s2 = inlined_call_operand.vmem [shape: f32[1,128], index: 2, kind: input, shape index: {}]   ;;  %s541_s3 = inlined_call_operand.hbm [shape: f32[128,128], index: 3, kind: input, shape index: {}]   ;;  %s542_s4 = inlined_call_operand.vmem [shape: f32[1,128], index: 4, kind: input, shape index: {}]   ;;  %s543_s5 = inlined_call_operand.hbm [shape: f32[8,128], index: 5, kind: output, shape index: {}]  }
   0x1   :  { %11 = vsyncpa [#allocation6], 0 }
   0x2   :  { %12 = vsyncpa [#allocation4], 0  ;;  %s465_s18 = smov [#allocation5]  }
   0x3   :  { %s28_s19 = sshll.u32 %s465_s18, 4  ;;  %s29_s19 = int_to_ptr.vmem [resolvable:$true] %s28_s19 }
   0x4   :  { %s387_s20 = scalar_lea.vmem %s29_s19, 4096  ;;  %p392_p1 = scmp.lt.s32.totalorder %s29_s19, %s29_s19 }
   0x5   :  { %p388_p0 = scmp.ne.s32.totalorder %s29_s19, %s387_s20  ;;  %p393_p2 = scmp.lt.s32.totalorder %s387_s20, %s387_s20 }
   0x7   :  { %p394_p3 = por %p393_p2, %p392_p1 }
   0x9   :  { %p395_p4 = pnand %p394_p3, %p388_p0 }
   0xb   :  { %398 = shalt.err (!%p395_p4)
}
   0xc   :  { %s466_s21 = smov 128   ;;  %s467_s22 = smov 8  }
   0xd   :  { %34 = dma.hbm_to_vmem [thread:$0]  %s539_s1, 4096, %s29_s19, [#allocation6], %s466_s21, %s466_s21, %s467_s22  }
   0xe   :  { %s468_s25 = smov [#allocation2]   ;;  %s469_s27 = smov [#allocation7]  }
   0xf   :  { %s19_s26 = sshll.u32 %s468_s25, 4  ;;  %s42_s28 = sshll.u32 %s469_s27, 4  ;;  %s20_s26 = int_to_ptr.vmem [resolvable:$true] %s19_s26  ;;  %s43_s28 = int_to_ptr.vmem [resolvable:$true] %s42_s28 }
  0x10   :  { %s407_s29 = scalar_lea.vmem %s20_s26, 256  ;;  %p412_p6 = scmp.lt.s32.totalorder %s20_s26, %s20_s26 }
  0x11   :  { %p408_p5 = scmp.ne.s32.totalorder %s20_s26, %s407_s29  ;;  %p413_p7 = scmp.lt.s32.totalorder %s407_s29, %s407_s29 }
  0x13   :  { %p414_p8 = por %p413_p7, %p412_p6 }
  0x15   :  { %p415_p9 = pnand %p414_p8, %p408_p5 }
  0x17   :  { %418 = shalt.err (!%p415_p9)
}
  0x18   :  { %22 = dma.hbm_to_vmem [thread:$0]  %s538_s0, 256, %s20_s26, [#allocation3]  }
  0x19   :  { %s427_s7 = scalar_lea.vmem %s43_s28, 2048  ;;  %p432_p11 = scmp.lt.s32.totalorder %s43_s28, %s43_s28 }
  0x1a   :  { %p428_p10 = scmp.ne.s32.totalorder %s43_s28, %s427_s7  ;;  %p433_p12 = scmp.lt.s32.totalorder %s427_s7, %s427_s7 }
  0x1c   :  { %p434_p13 = por %p433_p12, %p432_p11 }
  0x1e   :  { %p435_p0 = pnand %p434_p13, %p428_p10 }
  0x20   :  { %438 = shalt.err (!%p435_p0)
}
  0x21   :  { %48 = dma.hbm_to_vmem [thread:$0]  %s541_s3, 2048, %s43_s28, [#allocation6], %s466_s21, %s466_s21, %s467_s22  }
  0x22   :  { %459 = dma.done.wait [#allocation3], 256  }
  0x23   :  { %460 = vsyncadd [#allocation3], 4294967040 }
  0x24   :  { %461 = dma.done.wait [#allocation6], 6144  }
  0x25   :  { %462 = vsyncadd [#allocation6], 4294961152  ;;  %v470_v0 = vmov 0.0   ;;  %v93_v1 = vld [vmem:[#allocation5 + $0xf8] sm:$0xff]  ;;  %v92_v3 = vld [vmem:[#allocation5 + $0xf0] sm:$0xff]  ;;  %vm471_vm0 = vmmov 0  }
  0x26   :  { %336 = vmatprep.subr.mxu1 %v470_v0  ;;  %v77_v2 = vld [vmem:[#allocation5 + $0x78] sm:$0xff]  ;;  %284 = vmatprep.subr.mxu0 %v93_v1  ;;  %v76_v4 = vld [vmem:[#allocation5 + $0x70] sm:$0xff]  ;;  %v91_v5 = vld [vmem:[#allocation5 + $0xe8] sm:$0xff]  ;;  %s472_s11 = smov [#allocation8]  }
  0x27   :  { %285 = vmatpush3.msra.mxu0 %v77_v2  ;;  %v75_v6 = vld [vmem:[#allocation5 + $0x68] sm:$0xff]  ;;  %v90_v7 = vld [vmem:[#allocation5 + $0xe0] sm:$0xff]  ;;  %v89_v9 = vld [vmem:[#allocation5 + $0xd8] sm:$0xff]  ;;  %368 = vmatprep.mubr.msk.f32.mxu1 %vm471_vm0, %v470_v0  ;;  %s272_s12 = sshll.u32 %s472_s11, 4  ;;  %s273_s12 = int_to_ptr.vmem [resolvable:$true] %s272_s12 }
  0x28   :  { %286 = vmatprep.subr.mxu0 %v92_v3  ;;  %v74_v8 = vld [vmem:[#allocation5 + $0x60] sm:$0xff]  ;;  %v73_v10 = vld [vmem:[#allocation5 + $0x58] sm:$0xff]  ;;  %v88_v11 = vld [vmem:[#allocation5 + $0xd0] sm:$0xff]  ;;  %s439_s13 = scalar_lea.vmem %s273_s12, 128  ;;  %p444_p2 = scmp.lt.s32.totalorder %s273_s12, %s273_s12 }
  0x29   :  { %287 = vmatpush3.msra.mxu0 %v76_v4  ;;  %v72_v12 = vld [vmem:[#allocation5 + $0x50] sm:$0xff]  ;;  %v87_v13 = vld [vmem:[#allocation5 + $0xc8] sm:$0xff]  ;;  %v61_v14 = vld [vmem:[#allocation2 + $0x8] sm:$0xff]  ;;  %p440_p1 = scmp.ne.s32.totalorder %s273_s12, %s439_s13  ;;  %p445_p3 = scmp.lt.s32.totalorder %s439_s13, %s439_s13 }
  0x2a   :  { %288 = vmatprep.subr.mxu0 %v91_v5  ;;  %v71_v15 = vld [vmem:[#allocation5 + $0x48] sm:$0xff]  ;;  %165 = vmatprep.mubr.f32.mxu0 %v61_v14  ;;  %v187_v16 = vld [vmem:[#allocation7 + $0x78] sm:$0xff]  ;;  %v186_v17 = vld [vmem:[#allocation7 + $0x70] sm:$0xff] }
  0x2b   :  { %289 = vmatpush3.msra.mxu0 %v75_v6  ;;  %v86_v18 = vld [vmem:[#allocation5 + $0xc0] sm:$0xff]  ;;  %337 = vmatpush3.msra.mxu1 %v187_v16  ;;  %v185_v20 = vld [vmem:[#allocation7 + $0x68] sm:$0xff]  ;;  %v85_v21 = vld [vmem:[#allocation5 + $0xb8] sm:$0xff]  ;;  %p446_p4 = por %p445_p3, %p444_p2 }
  0x2c   :  { %290 = vmatprep.subr.mxu0 %v90_v7  ;;  %v70_v19 = vld [vmem:[#allocation5 + $0x40] sm:$0xff]  ;;  %338 = vmatprep.subr.mxu1 %v470_v0  ;;  %v69_v22 = vld [vmem:[#allocation5 + $0x38] sm:$0xff]  ;;  %v84_v24 = vld [vmem:[#allocation5 + $0xb0] sm:$0xff] }
  0x2d   :  { %291 = vmatpush3.msra.mxu0 %v74_v8  ;;  %339 = vmatpush3.msra.mxu1 %v186_v17  ;;  %v184_v23 = vld [vmem:[#allocation7 + $0x60] sm:$0xff]  ;;  %v68_v25 = vld [vmem:[#allocation5 + $0x30] sm:$0xff]  ;;  %v183_v26 = vld [vmem:[#allocation7 + $0x58] sm:$0xff]  ;;  %p447_p5 = pnand %p446_p4, %p440_p1 }
  0x2e   :  { %292 = vmatprep.subr.mxu0 %v89_v9  ;;  %340 = vmatprep.subr.mxu1 %v470_v0  ;;  %v83_v27 = vld [vmem:[#allocation5 + $0xa8] sm:$0xff]  ;;  %v182_v29 = vld [vmem:[#allocation7 + $0x50] sm:$0xff]  ;;  %v82_v30 = vld [vmem:[#allocation5 + $0xa0] sm:$0xff] }
  0x2f   :  { %293 = vmatpush3.msra.mxu0 %v73_v10  ;;  %341 = vmatpush3.msra.mxu1 %v185_v20  ;;  %v67_v28 = vld [vmem:[#allocation5 + $0x28] sm:$0xff]  ;;  %v66_v31 = vld [vmem:[#allocation5 + $0x20] sm:$0xff]  ;;  %v81_v33 = vld [vmem:[#allocation5 + $0x98] sm:$0xff] }
  0x30   :  { %294 = vmatprep.subr.mxu0 %v88_v11  ;;  %342 = vmatprep.subr.mxu1 %v470_v0  ;;  %v181_v32 = vld [vmem:[#allocation7 + $0x48] sm:$0xff]  ;;  %v65_v34 = vld [vmem:[#allocation5 + $0x18] sm:$0xff]  ;;  %v180_v35 = vld [vmem:[#allocation7 + $0x40] sm:$0xff] }
  0x31   :  { %295 = vmatpush3.msra.mxu0 %v72_v12  ;;  %343 = vmatpush3.msra.mxu1 %v184_v23  ;;  %v80_v36 = vld [vmem:[#allocation5 + $0x90] sm:$0xff]  ;;  %v179_v38 = vld [vmem:[#allocation7 + $0x38] sm:$0xff]  ;;  %v79_v39 = vld [vmem:[#allocation5 + $0x88] sm:$0xff] }
  0x32   :  { %296 = vmatprep.subr.mxu0 %v87_v13  ;;  %344 = vmatprep.subr.mxu1 %v470_v0  ;;  %v64_v37 = vld [vmem:[#allocation5 + $0x10] sm:$0xff]  ;;  %v63_v40 = vld [vmem:[#allocation5 + $0x8] sm:$0xff]  ;;  %v78_v42 = vld [vmem:[#allocation5 + $0x80] sm:$0xff] }
  0x33   :  { %297 = vmatpush3.msra.mxu0 %v71_v15  ;;  %345 = vmatpush3.msra.mxu1 %v183_v26  ;;  %v178_v41 = vld [vmem:[#allocation7 + $0x30] sm:$0xff]  ;;  %v62_v43 = vld [vmem:[#allocation5] sm:$0xff]  ;;  %v177_v44 = vld [vmem:[#allocation7 + $0x28] sm:$0xff] }
  0x34   :  { %298 = vmatprep.subr.mxu0 %v86_v18  ;;  %346 = vmatprep.subr.mxu1 %v470_v0  ;;  %v60_v45 = vld [vmem:[#allocation2] sm:$0xff]  ;;  %v176_v46 = vld [vmem:[#allocation7 + $0x20] sm:$0xff]  ;;  %v175_v47 = vld [vmem:[#allocation7 + $0x18] sm:$0xff] }
  0x35   :  { %299 = vmatpush3.msra.mxu0 %v70_v19  ;;  %347 = vmatpush3.msra.mxu1 %v182_v29  ;;  %v174_v48 = vld [vmem:[#allocation7 + $0x10] sm:$0xff]  ;;  %v173_v49 = vld [vmem:[#allocation7 + $0x8] sm:$0xff]  ;;  %v172_v50 = vld [vmem:[#allocation7] sm:$0xff] }
  0x36   :  { %300 = vmatprep.subr.mxu0 %v85_v21  ;;  %348 = vmatprep.subr.mxu1 %v470_v0  ;;  %v282_v52 = vld [vmem:[%s540_s2] ss:$0 sm:$0xff] }
  0x37   :  { %301 = vmatpush3.msra.mxu0 %v69_v22  ;;  %349 = vmatpush3.msra.mxu1 %v181_v32  ;;  %v283_v57 = vld [vmem:[%s542_s4] ss:$0 sm:$0xff] }
  0x38   :  { %302 = vmatprep.subr.mxu0 %v84_v24  ;;  %350 = vmatprep.subr.mxu1 %v470_v0 }
  0x39   :  { %303 = vmatpush3.msra.mxu0 %v68_v25  ;;  %351 = vmatpush3.msra.mxu1 %v180_v35 }
  0x3a   :  { %304 = vmatprep.subr.mxu0 %v83_v27  ;;  %352 = vmatprep.subr.mxu1 %v470_v0 }
  0x3b   :  { %305 = vmatpush3.msra.mxu0 %v67_v28  ;;  %353 = vmatpush3.msra.mxu1 %v179_v38 }
  0x3c   :  { %306 = vmatprep.subr.mxu0 %v82_v30  ;;  %354 = vmatprep.subr.mxu1 %v470_v0 }
  0x3d   :  { %307 = vmatpush3.msra.mxu0 %v66_v31  ;;  %355 = vmatpush3.msra.mxu1 %v178_v41 }
  0x3e   :  { %308 = vmatprep.subr.mxu0 %v81_v33  ;;  %356 = vmatprep.subr.mxu1 %v470_v0 }
  0x3f   :  { %309 = vmatpush3.msra.mxu0 %v65_v34  ;;  %357 = vmatpush3.msra.mxu1 %v177_v44 }
  0x40   :  { %310 = vmatprep.subr.mxu0 %v80_v36  ;;  %358 = vmatprep.subr.mxu1 %v470_v0 }
  0x41   :  { %311 = vmatpush3.msra.mxu0 %v64_v37  ;;  %359 = vmatpush3.msra.mxu1 %v176_v46 }
  0x42   :  { %312 = vmatprep.subr.mxu0 %v79_v39  ;;  %360 = vmatprep.subr.mxu1 %v470_v0 }
  0x43   :  { %313 = vmatpush3.msra.mxu0 %v63_v40  ;;  %361 = vmatpush3.msra.mxu1 %v175_v47 }
  0x44   :  { %314 = vmatprep.subr.mxu0 %v78_v42  ;;  %362 = vmatprep.subr.mxu1 %v470_v0 }
  0x45   :  { %315 = vmatpush3.msra.mxu0 %v62_v43  ;;  %363 = vmatpush3.msra.mxu1 %v174_v48 }
  0x46   :  { %166 = vmatmul.mubr.f32.vlgmr.msra.gmra.mxu0 %v60_v45  ;;  %364 = vmatprep.subr.mxu1 %v470_v0 }
  0x47   :  { %365 = vmatpush3.msra.mxu1 %v173_v49 }
  0x48   :  { %366 = vmatprep.subr.mxu1 %v470_v0 }
  0x49   :  { %367 = vmatpush3.msra.mxu1 %v172_v50 }
 0x106   :  { %v316_v51 = vpop.f32.mrf.mxu0 }
 0x108   :  { %v317_v53 = vpop.f32.mrf.mxu0 }
 0x109   :  { %v318_v54 = vadd.f32 %v317_v53, %v316_v51 }
 0x10b   :  { %v168_v55 = vadd.f32 %v318_v54, %v282_v52 }
 0x10d   :  { %v171_v56 = vmax.f32 %v168_v55, 0.0 }
 0x10f   :  { %369 = vmatmul.mubr.f32.vlgmr.msra.gmra.mxu1 %v171_v56 }
 0x1cf   :  { %v261_v58 = vpop.f32.mrf.mxu1 }
 0x1d0   :  { %v262_v59 = vadd.f32 %v283_v57, %v261_v58 }
 0x1d1   :  { %v370_v60 = vpop.f32.mrf.mxu1 }
 0x1d2   :  { %265 = vst [vmem:[#allocation8] sm:$0xff] %v262_v59 }
 0x1d3   :  { %450 = shalt.err (!%p447_p5)
}
 0x1d4   :  { %275 = dma.vmem_to_hbm [thread:$0]  %s273_s12, 128, %s543_s5, [#allocation4]  }
 0x1d5   :  { %463 = dma.done.wait [#allocation4], 128  }
 0x1d6   :  { %464 = vsyncadd [#allocation4], 4294967168 }
 0x1d7   :  { %279 = vsyncpa [#allocation3], 1 }
 0x1d8   :  { %280 = vsyncpa [#allocation6], 1 }
 0x1d9   :  { %281 = vsyncpa [#allocation4], 1 }

// kernel: tpu_custom_call.1
= control target key start
LH: loop header
LB: loop body
LE: loop exit
PB: predicated region body
PF: predicated region fallthrough
CT: control target
= control target key end

     0   :  { %10 = vsyncpa [#allocation3], 0  ;;  %s538_s0 = inlined_call_operand.hbm [shape: f32[8,256], index: 0, kind: input, shape index: {}]   ;;  %s539_s1 = inlined_call_operand.hbm [shape: f32[256,128], index: 1, kind: input, shape index: {}]   ;;  %s540_s2 = inlined_call_operand.vmem [shape: f32[1,128], index: 2, kind: input, shape index: {}]   ;;  %s541_s3 = inlined_call_operand.hbm [shape: f32[128,128], index: 3, kind: input, shape index: {}]   ;;  %s542_s4 = inlined_call_operand.vmem [shape: f32[1,128], index: 4, kind: input, shape index: {}]   ;;  %s543_s5 = inlined_call_operand.hbm [shape: f32[8,128], index: 5, kind: output, shape index: {}]  }
   0x1   :  { %11 = vsyncpa [#allocation6], 0 }
   0x2   :  { %12 = vsyncpa [#allocation4], 0  ;;  %s465_s18 = smov [#allocation5]  }
   0x3   :  { %s28_s19 = sshll.u32 %s465_s18, 4  ;;  %s29_s19 = int_to_ptr.vmem [resolvable:$true] %s28_s19 }
   0x4   :  { %s387_s20 = scalar_lea.vmem %s29_s19, 4096  ;;  %p392_p1 = scmp.lt.s32.totalorder %s29_s19, %s29_s19 }
   0x5   :  { %p388_p0 = scmp.ne.s32.totalorder %s29_s19, %s387_s20  ;;  %p393_p2 = scmp.lt.s32.totalorder %s387_s20, %s387_s20 }
   0x7   :  { %p394_p3 = por %p393_p2, %p392_p1 }
   0x9   :  { %p395_p4 = pnand %p394_p3, %p388_p0 }
   0xb   :  { %398 = shalt.err (!%p395_p4)
}
   0xc   :  { %s466_s21 = smov 128   ;;  %s467_s22 = smov 8  }
   0xd   :  { %34 = dma.hbm_to_vmem [thread:$0]  %s539_s1, 4096, %s29_s19, [#allocation6], %s466_s21, %s466_s21, %s467_s22  }
   0xe   :  { %s468_s25 = smov [#allocation2]   ;;  %s469_s27 = smov [#allocation7]  }
   0xf   :  { %s19_s26 = sshll.u32 %s468_s25, 4  ;;  %s42_s28 = sshll.u32 %s469_s27, 4  ;;  %s20_s26 = int_to_ptr.vmem [resolvable:$true] %s19_s26  ;;  %s43_s28 = int_to_ptr.vmem [resolvable:$true] %s42_s28 }
  0x10   :  { %s407_s29 = scalar_lea.vmem %s20_s26, 256  ;;  %p412_p6 = scmp.lt.s32.totalorder %s20_s26, %s20_s26 }
  0x11   :  { %p408_p5 = scmp.ne.s32.totalorder %s20_s26, %s407_s29  ;;  %p413_p7 = scmp.lt.s32.totalorder %s407_s29, %s407_s29 }
  0x13   :  { %p414_p8 = por %p413_p7, %p412_p6 }
  0x15   :  { %p415_p9 = pnand %p414_p8, %p408_p5 }
  0x17   :  { %418 = shalt.err (!%p415_p9)
}
  0x18   :  { %22 = dma.hbm_to_vmem [thread:$0]  %s538_s0, 256, %s20_s26, [#allocation3]  }
  0x19   :  { %s427_s7 = scalar_lea.vmem %s43_s28, 2048  ;;  %p432_p11 = scmp.lt.s32.totalorder %s43_s28, %s43_s28 }
  0x1a   :  { %p428_p10 = scmp.ne.s32.totalorder %s43_s28, %s427_s7  ;;  %p433_p12 = scmp.lt.s32.totalorder %s427_s7, %s427_s7 }
  0x1c   :  { %p434_p13 = por %p433_p12, %p432_p11 }
  0x1e   :  { %p435_p0 = pnand %p434_p13, %p428_p10 }
  0x20   :  { %438 = shalt.err (!%p435_p0)
}
  0x21   :  { %48 = dma.hbm_to_vmem [thread:$0]  %s541_s3, 2048, %s43_s28, [#allocation6], %s466_s21, %s466_s21, %s467_s22  }
  0x22   :  { %459 = dma.done.wait [#allocation3], 256  }
  0x23   :  { %460 = vsyncadd [#allocation3], 4294967040 }
  0x24   :  { %461 = dma.done.wait [#allocation6], 6144  }
  0x25   :  { %462 = vsyncadd [#allocation6], 4294961152  ;;  %v470_v0 = vmov 0.0   ;;  %v93_v1 = vld [vmem:[#allocation5 + $0xf8] sm:$0xff]  ;;  %v92_v3 = vld [vmem:[#allocation5 + $0xf0] sm:$0xff]  ;;  %vm471_vm0 = vmmov 0  }
  0x26   :  { %336 = vmatprep.subr.mxu1 %v470_v0  ;;  %v77_v2 = vld [vmem:[#allocation5 + $0x78] sm:$0xff]  ;;  %284 = vmatprep.subr.mxu0 %v93_v1  ;;  %v76_v4 = vld [vmem:[#allocation5 + $0x70] sm:$0xff]  ;;  %v91_v5 = vld [vmem:[#allocation5 + $0xe8] sm:$0xff]  ;;  %s472_s11 = smov [#allocation8]  }
  0x27   :  { %285 = vmatpush3.msra.mxu0 %v77_v2  ;;  %v75_v6 = vld [vmem:[#allocation5 + $0x68] sm:$0xff]  ;;  %v90_v7 = vld [vmem:[#allocation5 + $0xe0] sm:$0xff]  ;;  %v89_v9 = vld [vmem:[#allocation5 + $0xd8] sm:$0xff]  ;;  %368 = vmatprep.mubr.msk.f32.mxu1 %vm471_vm0, %v470_v0  ;;  %s272_s12 = sshll.u32 %s472_s11, 4  ;;  %s273_s12 = int_to_ptr.vmem [resolvable:$true] %s272_s12 }
  0x28   :  { %286 = vmatprep.subr.mxu0 %v92_v3  ;;  %v74_v8 = vld [vmem:[#allocation5 + $0x60] sm:$0xff]  ;;  %v73_v10 = vld [vmem:[#allocation5 + $0x58] sm:$0xff]  ;;  %v88_v11 = vld [vmem:[#allocation5 + $0xd0] sm:$0xff]  ;;  %s439_s13 = scalar_lea.vmem %s273_s12, 128  ;;  %p444_p2 = scmp.lt.s32.totalorder %s273_s12, %s273_s12 }
  0x29   :  { %287 = vmatpush3.msra.mxu0 %v76_v4  ;;  %v72_v12 = vld [vmem:[#allocation5 + $0x50] sm:$0xff]  ;;  %v87_v13 = vld [vmem:[#allocation5 + $0xc8] sm:$0xff]  ;;  %v61_v14 = vld [vmem:[#allocation2 + $0x8] sm:$0xff]  ;;  %p440_p1 = scmp.ne.s32.totalorder %s273_s12, %s439_s13  ;;  %p445_p3 = scmp.lt.s32.totalorder %s439_s13, %s439_s13 }
  0x2a   :  { %288 = vmatprep.subr.mxu0 %v91_v5  ;;  %v71_v15 = vld [vmem:[#allocation5 + $0x48] sm:$0xff]  ;;  %165 = vmatprep.mubr.f32.mxu0 %v61_v14  ;;  %v187_v16 = vld [vmem:[#allocation7 + $0x78] sm:$0xff]  ;;  %v186_v17 = vld [vmem:[#allocation7 + $0x70] sm:$0xff] }
  0x2b   :  { %289 = vmatpush3.msra.mxu0 %v75_v6  ;;  %v86_v18 = vld [vmem:[#allocation5 + $0xc0] sm:$0xff]  ;;  %337 = vmatpush3.msra.mxu1 %v187_v16  ;;  %v185_v20 = vld [vmem:[#allocation7 + $0x68] sm:$0xff]  ;;  %v85_v21 = vld [vmem:[#allocation5 + $0xb8] sm:$0xff]  ;;  %p446_p4 = por %p445_p3, %p444_p2 }
  0x2c   :  { %290 = vmatprep.subr.mxu0 %v90_v7  ;;  %v70_v19 = vld [vmem:[#allocation5 + $0x40] sm:$0xff]  ;;  %338 = vmatprep.subr.mxu1 %v470_v0  ;;  %v69_v22 = vld [vmem:[#allocation5 + $0x38] sm:$0xff]  ;;  %v84_v24 = vld [vmem:[#allocation5 + $0xb0] sm:$0xff] }
  0x2d   :  { %291 = vmatpush3.msra.mxu0 %v74_v8  ;;  %339 = vmatpush3.msra.mxu1 %v186_v17  ;;  %v184_v23 = vld [vmem:[#allocation7 + $0x60] sm:$0xff]  ;;  %v68_v25 = vld [vmem:[#allocation5 + $0x30] sm:$0xff]  ;;  %v183_v26 = vld [vmem:[#allocation7 + $0x58] sm:$0xff]  ;;  %p447_p5 = pnand %p446_p4, %p440_p1 }
  0x2e   :  { %292 = vmatprep.subr.mxu0 %v89_v9  ;;  %340 = vmatprep.subr.mxu1 %v470_v0  ;;  %v83_v27 = vld [vmem:[#allocation5 + $0xa8] sm:$0xff]  ;;  %v182_v29 = vld [vmem:[#allocation7 + $0x50] sm:$0xff]  ;;  %v82_v30 = vld [vmem:[#allocation5 + $0xa0] sm:$0xff] }
  0x2f   :  { %293 = vmatpush3.msra.mxu0 %v73_v10  ;;  %341 = vmatpush3.msra.mxu1 %v185_v20  ;;  %v67_v28 = vld [vmem:[#allocation5 + $0x28] sm:$0xff]  ;;  %v66_v31 = vld [vmem:[#allocation5 + $0x20] sm:$0xff]  ;;  %v81_v33 = vld [vmem:[#allocation5 + $0x98] sm:$0xff] }
  0x30   :  { %294 = vmatprep.subr.mxu0 %v88_v11  ;;  %342 = vmatprep.subr.mxu1 %v470_v0  ;;  %v181_v32 = vld [vmem:[#allocation7 + $0x48] sm:$0xff]  ;;  %v65_v34 = vld [vmem:[#allocation5 + $0x18] sm:$0xff]  ;;  %v180_v35 = vld [vmem:[#allocation7 + $0x40] sm:$0xff] }
  0x31   :  { %295 = vmatpush3.msra.mxu0 %v72_v12  ;;  %343 = vmatpush3.msra.mxu1 %v184_v23  ;;  %v80_v36 = vld [vmem:[#allocation5 + $0x90] sm:$0xff]  ;;  %v179_v38 = vld [vmem:[#allocation7 + $0x38] sm:$0xff]  ;;  %v79_v39 = vld [vmem:[#allocation5 + $0x88] sm:$0xff] }
  0x32   :  { %296 = vmatprep.subr.mxu0 %v87_v13  ;;  %344 = vmatprep.subr.mxu1 %v470_v0  ;;  %v64_v37 = vld [vmem:[#allocation5 + $0x10] sm:$0xff]  ;;  %v63_v40 = vld [vmem:[#allocation5 + $0x8] sm:$0xff]  ;;  %v78_v42 = vld [vmem:[#allocation5 + $0x80] sm:$0xff] }
  0x33   :  { %297 = vmatpush3.msra.mxu0 %v71_v15  ;;  %345 = vmatpush3.msra.mxu1 %v183_v26  ;;  %v178_v41 = vld [vmem:[#allocation7 + $0x30] sm:$0xff]  ;;  %v62_v43 = vld [vmem:[#allocation5] sm:$0xff]  ;;  %v177_v44 = vld [vmem:[#allocation7 + $0x28] sm:$0xff] }
  0x34   :  { %298 = vmatprep.subr.mxu0 %v86_v18  ;;  %346 = vmatprep.subr.mxu1 %v470_v0  ;;  %v60_v45 = vld [vmem:[#allocation2] sm:$0xff]  ;;  %v176_v46 = vld [vmem:[#allocation7 + $0x20] sm:$0xff]  ;;  %v175_v47 = vld [vmem:[#allocation7 + $0x18] sm:$0xff] }
  0x35   :  { %299 = vmatpush3.msra.mxu0 %v70_v19  ;;  %347 = vmatpush3.msra.mxu1 %v182_v29  ;;  %v174_v48 = vld [vmem:[#allocation7 + $0x10] sm:$0xff]  ;;  %v173_v49 = vld [vmem:[#allocation7 + $0x8] sm:$0xff]  ;;  %v172_v50 = vld [vmem:[#allocation7] sm:$0xff] }
  0x36   :  { %300 = vmatprep.subr.mxu0 %v85_v21  ;;  %348 = vmatprep.subr.mxu1 %v470_v0  ;;  %v282_v52 = vld [vmem:[%s540_s2] ss:$0 sm:$0xff] }
  0x37   :  { %301 = vmatpush3.msra.mxu0 %v69_v22  ;;  %349 = vmatpush3.msra.mxu1 %v181_v32  ;;  %v283_v57 = vld [vmem:[%s542_s4] ss:$0 sm:$0xff] }
  0x38   :  { %302 = vmatprep.subr.mxu0 %v84_v24  ;;  %350 = vmatprep.subr.mxu1 %v470_v0 }
  0x39   :  { %303 = vmatpush3.msra.mxu0 %v68_v25  ;;  %351 = vmatpush3.msra.mxu1 %v180_v35 }
  0x3a   :  { %304 = vmatprep.subr.mxu0 %v83_v27  ;;  %352 = vmatprep.subr.mxu1 %v470_v0 }
  0x3b   :  { %305 = vmatpush3.msra.mxu0 %v67_v28  ;;  %353 = vmatpush3.msra.mxu1 %v179_v38 }
  0x3c   :  { %306 = vmatprep.subr.mxu0 %v82_v30  ;;  %354 = vmatprep.subr.mxu1 %v470_v0 }
  0x3d   :  { %307 = vmatpush3.msra.mxu0 %v66_v31  ;;  %355 = vmatpush3.msra.mxu1 %v178_v41 }
  0x3e   :  { %308 = vmatprep.subr.mxu0 %v81_v33  ;;  %356 = vmatprep.subr.mxu1 %v470_v0 }
  0x3f   :  { %309 = vmatpush3.msra.mxu0 %v65_v34  ;;  %357 = vmatpush3.msra.mxu1 %v177_v44 }
  0x40   :  { %310 = vmatprep.subr.mxu0 %v80_v36  ;;  %358 = vmatprep.subr.mxu1 %v470_v0 }
  0x41   :  { %311 = vmatpush3.msra.mxu0 %v64_v37  ;;  %359 = vmatpush3.msra.mxu1 %v176_v46 }
  0x42   :  { %312 = vmatprep.subr.mxu0 %v79_v39  ;;  %360 = vmatprep.subr.mxu1 %v470_v0 }
  0x43   :  { %313 = vmatpush3.msra.mxu0 %v63_v40  ;;  %361 = vmatpush3.msra.mxu1 %v175_v47 }
  0x44   :  { %314 = vmatprep.subr.mxu0 %v78_v42  ;;  %362 = vmatprep.subr.mxu1 %v470_v0 }
  0x45   :  { %315 = vmatpush3.msra.mxu0 %v62_v43  ;;  %363 = vmatpush3.msra.mxu1 %v174_v48 }
  0x46   :  { %166 = vmatmul.mubr.f32.vlgmr.msra.gmra.mxu0 %v60_v45  ;;  %364 = vmatprep.subr.mxu1 %v470_v0 }
  0x47   :  { %365 = vmatpush3.msra.mxu1 %v173_v49 }
  0x48   :  { %366 = vmatprep.subr.mxu1 %v470_v0 }
  0x49   :  { %367 = vmatpush3.msra.mxu1 %v172_v50 }
 0x106   :  { %v316_v51 = vpop.f32.mrf.mxu0 }
 0x108   :  { %v317_v53 = vpop.f32.mrf.mxu0 }
 0x109   :  { %v318_v54 = vadd.f32 %v317_v53, %v316_v51 }
 0x10b   :  { %v168_v55 = vadd.f32 %v318_v54, %v282_v52 }
 0x10d   :  { %v171_v56 = vmax.f32 %v168_v55, 0.0 }
 0x10f   :  { %369 = vmatmul.mubr.f32.vlgmr.msra.gmra.mxu1 %v171_v56 }
 0x1cf   :  { %v261_v58 = vpop.f32.mrf.mxu1 }
 0x1d0   :  { %v262_v59 = vadd.f32 %v283_v57, %v261_v58 }
 0x1d1   :  { %v370_v60 = vpop.f32.mrf.mxu1 }
 0x1d2   :  { %265 = vst [vmem:[#allocation8] sm:$0xff] %v262_v59 }
 0x1d3   :  { %450 = shalt.err (!%p447_p5)
}
 0x1d4   :  { %275 = dma.vmem_to_hbm [thread:$0]  %s273_s12, 128, %s543_s5, [#allocation4]  }
 0x1d5   :  { %463 = dma.done.wait [#allocation4], 128  }
 0x1d6   :  { %464 = vsyncadd [#allocation4], 4294967168 }
 0x1d7   :  { %279 = vsyncpa [#allocation3], 1 }
 0x1d8   :  { %280 = vsyncpa [#allocation6], 1 }
 0x1d9   :  { %281 = vsyncpa [#allocation4], 1 }

</bundles_post_ra>
